<compile_context>
chip_gen: v5e
topology: v5e:2x2
jax: 0.10.0
libtpu: 0.0.40
codegen_flags: <defaults>
</compile_context>

<pallas_src>
import jax
import jax.numpy as jnp
from jax.experimental import pallas as pl
from jax.experimental.pallas import tpu as pltpu

BN_EPS = 1e-5


# ----------------------------------------------------------------------------
# Kernel
# ----------------------------------------------------------------------------
def top_model_kernel(a_ref, b_ref, w_ref, vec_ref, out_ref):
    a = a_ref[...].astype(jnp.float32)          # (TB, 10)
    b = b_ref[...].astype(jnp.float32)          # (TB, 10)

    vec = vec_ref[...]                          # (16, 20) packed f32 vectors
    s0 = vec[0:1, :]                            # bn0 scale          (1, 20)
    t0 = vec[1:2, :]                            # bn0 shift          (1, 20)
    s1 = vec[2:3, :]                            # bn1 scale (post-dot, f32)
    b1 = vec[3:4, :]                            # fc1 bias + bn1 shift folded
    s2 = vec[4:5, 0:10]                         # bn2 scale
    b2 = vec[5:6, 0:10]                         # fc2 bias + bn2 shift folded
    s3 = vec[6:7, 0:10]                         # bn3 scale
    b3 = vec[7:8, 0:10]                         # fc3 bias + bn3 shift folded
    b4 = vec[8:9, 0:10]                         # fc4 bias

    mm = w_ref.dtype                            # matmul operand dtype (f32/bf16)
    w1 = w_ref[0:20, 0:20]                      # fc1 W^T  (20, 20)
    w2 = w_ref[32:52, 0:10]                     # fc2 W^T  (20, 10)
    w3 = w_ref[64:74, 0:10]                     # fc3 W^T  (10, 10)
    w4 = w_ref[80:90, 0:10]                     # fc4 W^T  (10, 10)

    # torch.cat((a, b), dim=1) fused: lane-concat the two halves in-kernel.
    x = jnp.concatenate([a, b], axis=-1)        # (TB, 20)

    # fc1top(relu(bn0top(x)));  bn1 shift folded into b1, scale applied post-dot.
    h = jnp.maximum(x * s0 + t0, 0.0)
    h = jnp.dot(h.astype(mm), w1, preferred_element_type=jnp.float32) * s1 + b1
    # fc2top(relu(bn1top(.)));  bn2 folded the same way.
    h = jnp.maximum(h, 0.0)
    h = jnp.dot(h.astype(mm), w2, preferred_element_type=jnp.float32) * s2 + b2
    # fc3top(relu(bn2top(.)));  bn3 folded the same way.
    h = jnp.maximum(h, 0.0)
    h = jnp.dot(h.astype(mm), w3, preferred_element_type=jnp.float32) * s3 + b3
    # fc4top(relu(bn3top(.)))
    h = jnp.maximum(h, 0.0)
    h = jnp.dot(h.astype(mm), w4, preferred_element_type=jnp.float32) + b4

    # log_softmax along features (dim=1), all in f32.
    mx = jnp.max(h, axis=-1, keepdims=True)
    z = h - mx
    lse = jnp.log(jnp.sum(jnp.exp(z), axis=-1, keepdims=True))
    out_ref[...] = (z - lse).astype(out_ref.dtype)


# ----------------------------------------------------------------------------
# Wrapper
# ----------------------------------------------------------------------------
def _tile_budget():
    """Generation-aware (batch-tile cap, vmem_limit_bytes).

    A (block_b, 10) f32 block lane-pads to 128 lanes in VMEM (512 B/row);
    three activation refs (a, b, out) x double-buffering ~= block_b * 3 KiB:
      v7x   (64 MiB physical VMEM):  cap  8192 rows, limit 48 MiB
      v5e/v6e (128 MiB physical):    cap 16384 rows, limit 96 MiB
    """
    try:
        vmem_cap = int(pltpu.get_tpu_info().vmem_capacity_bytes)
    except Exception:
        vmem_cap = 64 * 1024 * 1024            # conservative (v7x-sized)
    if vmem_cap >= 128 * 1024 * 1024:
        return 16384, 96 * 1024 * 1024
    return 8192, 48 * 1024 * 1024


def top_model_forward(input_a, input_b, kernel_params, *, block_b=None,
                      vmem_limit_bytes=None):
    """input_a, input_b: (B, 10) bottom-model outputs (f32 or bf16).
    Returns (B, 10) f32 log-probs."""
    B = input_a.shape[0]
    w_slab, vec = kernel_params

    cap_rows, default_vmem = _tile_budget()
    if vmem_limit_bytes is None:
        vmem_limit_bytes = default_vmem
    if block_b is None:
        if B <= 2048:
            # Single grid step: per-step overhead already dominates payload
            # below this size, so splitting only adds cost.
            block_b = B
        else:
            # >= 2 grid steps so ("parallel",) can use both v7x TensorCores,
            # capped by the generation-aware VMEM budget.
            two_way = ((-(-B // 2)) + 7) // 8 * 8
            block_b = min(cap_rows, two_way)
    block_b = min(block_b, B)

    grid = (pl.cdiv(B, block_b),)
    x_spec = pl.BlockSpec((block_b, 10), lambda i: (i, 0))
    const = lambda arr: pl.BlockSpec(arr.shape, lambda i: (0, 0))

    return pl.pallas_call(
        top_model_kernel,
        out_shape=jax.ShapeDtypeStruct((B, 10), jnp.float32),
        grid=grid,
        in_specs=[x_spec, x_spec, const(w_slab), const(vec)],
        out_specs=pl.BlockSpec((block_b, 10), lambda i: (i, 0)),
        compiler_params=pltpu.CompilerParams(
            dimension_semantics=("parallel",),
            vmem_limit_bytes=vmem_limit_bytes,
        ),
    )(input_a, input_b, w_slab, vec)


# ----------------------------------------------------------------------------
# Parameter handling (wrapper-time folding / packing)
# ----------------------------------------------------------------------------
def init_raw_params(key, randomize_bn=True):
    """PyTorch-layout params: Linear weights (out, in) via kaiming_normal_,
    biases via default nn.Linear uniform, BN gamma/beta/mean/var per layer."""
    keys = jax.random.split(key, 24)

    def kaiming(k, out_f, in_f):
        std = (2.0 / in_f) ** 0.5
        return std * jax.random.normal(k, (out_f, in_f), dtype=jnp.float32)

    def lin_bias(k, out_f, in_f):
        bound = 1.0 / (in_f ** 0.5)
        return jax.random.uniform(k, (out_f,), jnp.float32, -bound, bound)

    def bn(k0, k1, k2, k3, n):
        if randomize_bn:
            gamma = jax.random.uniform(k0, (n,), jnp.float32, 0.5, 1.5)
            beta = 0.1 * jax.random.normal(k1, (n,), jnp.float32)
            mean = 0.1 * jax.random.normal(k2, (n,), jnp.float32)
            var = jax.random.uniform(k3, (n,), jnp.float32, 0.5, 1.5)
        else:
            gamma, beta = jnp.ones((n,), jnp.float32), jnp.zeros((n,), jnp.float32)
            mean, var = jnp.zeros((n,), jnp.float32), jnp.ones((n,), jnp.float32)
        return (gamma, beta, mean, var)

    return {
        "w1": kaiming(keys[0], 20, 20), "b1": lin_bias(keys[1], 20, 20),
        "w2": kaiming(keys[2], 10, 20), "b2": lin_bias(keys[3], 10, 20),
        "w3": kaiming(keys[4], 10, 10), "b3": lin_bias(keys[5], 10, 10),
        "w4": kaiming(keys[6], 10, 10), "b4": lin_bias(keys[7], 10, 10),
        "bn0": bn(*keys[8:12], 20),
        "bn1": bn(*keys[12:16], 20),
        "bn2": bn(*keys[16:20], 10),
        "bn3": bn(*keys[20:24], 10),
    }


def _bn_scale_shift(bn_params):
    gamma, beta, mean, var = bn_params
    scale = gamma * jax.lax.rsqrt(var + BN_EPS)
    shift = beta - mean * scale
    return scale, shift


def prepare_params(raw, weight_dtype=jnp.float32):
    """Pack weights into one slab and small vectors into one f32 slab.

    Weights are stored UNscaled (BN scales are applied post-dot in f32 inside
    the kernel); only the BN shift is folded into the preceding bias."""
    s0, t0 = _bn_scale_shift(raw["bn0"])
    s1, t1 = _bn_scale_shift(raw["bn1"])
    s2, t2 = _bn_scale_shift(raw["bn2"])
    s3, t3 = _bn_scale_shift(raw["bn3"])

    w1t = raw["w1"].T            # (20, 20)  (in, out)
    w2t = raw["w2"].T            # (20, 10)
    w3t = raw["w3"].T            # (10, 10)
    w4t = raw["w4"].T            # (10, 10)

    slab = jnp.zeros((96, 20), weight_dtype)
    slab = slab.at[0:20, 0:20].set(w1t.astype(weight_dtype))
    slab = slab.at[32:52, 0:10].set(w2t.astype(weight_dtype))
    slab = slab.at[64:74, 0:10].set(w3t.astype(weight_dtype))
    slab = slab.at[80:90, 0:10].set(w4t.astype(weight_dtype))

    vec = jnp.zeros((16, 20), jnp.float32)
    vec = vec.at[0, :].set(s0)
    vec = vec.at[1, :].set(t0)
    vec = vec.at[2, :].set(s1)
    vec = vec.at[3, :].set(raw["b1"] * s1 + t1)
    vec = vec.at[4, 0:10].set(s2)
    vec = vec.at[5, 0:10].set(raw["b2"] * s2 + t2)
    vec = vec.at[6, 0:10].set(s3)
    vec = vec.at[7, 0:10].set(raw["b3"] * s3 + t3)
    vec = vec.at[8, 0:10].set(raw["b4"])
    return (slab, vec)


def reference_forward(input_a, input_b, raw):
    """Pure-JAX reference mirroring the PyTorch forward (eval-mode BN)."""
    def bn(h, p):
        g, be, m, v = p
        return (h - m) * jax.lax.rsqrt(v + BN_EPS) * g + be

    x = jnp.concatenate([input_a, input_b], axis=1)
    h = jnp.maximum(bn(x, raw["bn0"]), 0.0) @ raw["w1"].T + raw["b1"]
    h = jnp.maximum(bn(h, raw["bn1"]), 0.0) @ raw["w2"].T + raw["b2"]
    h = jnp.maximum(bn(h, raw["bn2"]), 0.0) @ raw["w3"].T + raw["b3"]
    h = jnp.maximum(bn(h, raw["bn3"]), 0.0) @ raw["w4"].T + raw["b4"]
    return jax.nn.log_softmax(h, axis=-1)


# ----------------------------------------------------------------------------
# Tests
# ----------------------------------------------------------------------------
if __name__ == "__main__":
    # TODO(synk): train-mode BatchNorm (batch statistics) is not modelled; this
    # matches model.eval() with loaded running stats.
    key = jax.random.PRNGKey(0)
    k_a, k_b, k_p = jax.random.split(key, 3)

    B = 32
    input_a = jax.random.normal(k_a, (B, 10), dtype=jnp.float32)
    input_b = jax.random.normal(k_b, (B, 10), dtype=jnp.float32)

    raw = init_raw_params(k_p, randomize_bn=True)
    ref = reference_forward(input_a, input_b, raw)
    params_f32 = prepare_params(raw, weight_dtype=jnp.float32)

    # --- default path: B <= 2048 -> single grid step ---
    out = jax.block_until_ready(top_model_forward(input_a, input_b, params_f32))
    assert out.shape == (B, 10)
    assert bool(jnp.allclose(jnp.sum(jnp.exp(out), axis=-1), 1.0, atol=1e-4))
    assert bool(jnp.allclose(out, ref, atol=1e-4, rtol=1e-4)), \
        float(jnp.max(jnp.abs(out - ref)))

    # --- explicit small tile: multi-step grid + partial final block ---
    out_blk = jax.block_until_ready(
        top_model_forward(input_a[:12], input_b[:12], params_f32, block_b=8))
    assert bool(jnp.allclose(out_blk, ref[:12], atol=1e-4, rtol=1e-4))

    # --- all-negative-logits: lane padding must not leak into the axis=-1
    #     max / sum(exp) of the log-softmax (uniform bias shift leaves
    #     log-probs unchanged) ---
    raw_neg = dict(raw)
    raw_neg["b4"] = raw["b4"] - 30.0
    out_neg = jax.block_until_ready(
        top_model_forward(input_a, input_b, prepare_params(raw_neg), block_b=8))
    assert bool(jnp.allclose(out_neg, ref, atol=1e-3, rtol=1e-3))

    # --- larger batch: exercises the generation-aware default tile and the
    #     >=2-step ("parallel") grid split, with a partial last block ---
    BL = 2500
    ka2, kb2 = jax.random.split(jax.random.PRNGKey(1))
    big_a = jax.random.normal(ka2, (BL, 10), dtype=jnp.float32)
    big_b = jax.random.normal(kb2, (BL, 10), dtype=jnp.float32)
    ref_big = reference_forward(big_a, big_b, raw)
    out_big = jax.block_until_ready(top_model_forward(big_a, big_b, params_f32))
    assert bool(jnp.allclose(out_big, ref_big, atol=1e-4, rtol=1e-4))

    # --- bf16 producer outputs (halves input HBM traffic); f32 weights ---
    out_bf16_in = jax.block_until_ready(
        top_model_forward(input_a.astype(jnp.bfloat16),
                          input_b.astype(jnp.bfloat16), params_f32))
    assert bool(jnp.allclose(out_bf16_in, ref, atol=0.1, rtol=0.05))

    # --- bf16 weight path (BN scales applied post-dot in f32) ---
    params_bf16 = prepare_params(raw, weight_dtype=jnp.bfloat16)
    out_bf16_w = jax.block_until_ready(
        top_model_forward(input_a, input_b, params_bf16))
    assert bool(jnp.allclose(jnp.sum(jnp.exp(out_bf16_w), axis=-1), 1.0, atol=1e-3))
    assert bool(jnp.allclose(out_bf16_w, ref, atol=0.15, rtol=0.05))

    print("KERNEL_OK")
</pallas_src>

<mosaic_0001>
module attributes {stable_mosaic.version = 11 : i64} {
  func.func @top_model_kernel(%arg0: i32, %arg1: memref<32x10xf32, #tpu.memory_space<vmem>>, %arg2: memref<32x10xf32, #tpu.memory_space<vmem>>, %arg3: memref<96x20xf32, #tpu.memory_space<vmem>>, %arg4: memref<16x20xf32, #tpu.memory_space<vmem>>, %arg5: memref<32x10xf32, #tpu.memory_space<vmem>>) attributes {dimension_semantics = [#tpu.dimension_semantics<parallel>], iteration_bounds = array<i64: 1>, scalar_prefetch = 0 : i64, scratch_operands = 0 : i64, tpu.core_type = #tpu.core_type<tc>, window_params = [{transform_indices = @transform_0, window_bounds = array<i64: 32, 10>}, {transform_indices = @transform_1, window_bounds = array<i64: 32, 10>}, {pipeline_mode = #tpu.pipeline_mode<synchronous>, transform_indices = @transform_2, window_bounds = array<i64: 96, 20>}, {pipeline_mode = #tpu.pipeline_mode<synchronous>, transform_indices = @transform_3, window_bounds = array<i64: 16, 20>}, {transform_indices = @transform_4, window_bounds = array<i64: 32, 10>}]} {
    %c0 = arith.constant 0 : index
    %c0_0 = arith.constant 0 : index
    %0 = vector.load %arg1[%c0, %c0_0] : memref<32x10xf32, #tpu.memory_space<vmem>>, vector<32x10xf32>
    %c0_1 = arith.constant 0 : index
    %c0_2 = arith.constant 0 : index
    %1 = vector.load %arg2[%c0_1, %c0_2] : memref<32x10xf32, #tpu.memory_space<vmem>>, vector<32x10xf32>
    %c0_3 = arith.constant 0 : index
    %c0_4 = arith.constant 0 : index
    %2 = vector.load %arg4[%c0_3, %c0_4] : memref<16x20xf32, #tpu.memory_space<vmem>>, vector<16x20xf32>
    %3 = vector.extract_strided_slice %2 {offsets = [0, 0], sizes = [1, 20], strides = [1, 1]} : vector<16x20xf32> to vector<1x20xf32>
    %4 = vector.extract_strided_slice %2 {offsets = [1, 0], sizes = [1, 20], strides = [1, 1]} : vector<16x20xf32> to vector<1x20xf32>
    %5 = vector.extract_strided_slice %2 {offsets = [2, 0], sizes = [1, 20], strides = [1, 1]} : vector<16x20xf32> to vector<1x20xf32>
    %6 = vector.extract_strided_slice %2 {offsets = [3, 0], sizes = [1, 20], strides = [1, 1]} : vector<16x20xf32> to vector<1x20xf32>
    %7 = vector.extract_strided_slice %2 {offsets = [4, 0], sizes = [1, 10], strides = [1, 1]} : vector<16x20xf32> to vector<1x10xf32>
    %8 = vector.extract_strided_slice %2 {offsets = [5, 0], sizes = [1, 10], strides = [1, 1]} : vector<16x20xf32> to vector<1x10xf32>
    %9 = vector.extract_strided_slice %2 {offsets = [6, 0], sizes = [1, 10], strides = [1, 1]} : vector<16x20xf32> to vector<1x10xf32>
    %10 = vector.extract_strided_slice %2 {offsets = [7, 0], sizes = [1, 10], strides = [1, 1]} : vector<16x20xf32> to vector<1x10xf32>
    %11 = vector.extract_strided_slice %2 {offsets = [8, 0], sizes = [1, 10], strides = [1, 1]} : vector<16x20xf32> to vector<1x10xf32>
    %c0_5 = arith.constant 0 : index
    %c0_6 = arith.constant 0 : index
    %12 = vector.load %arg3[%c0_5, %c0_6] : memref<96x20xf32, #tpu.memory_space<vmem>>, vector<20x20xf32>
    %c32 = arith.constant 32 : index
    %c0_7 = arith.constant 0 : index
    %13 = vector.load %arg3[%c32, %c0_7] : memref<96x20xf32, #tpu.memory_space<vmem>>, vector<20x10xf32>
    %c64 = arith.constant 64 : index
    %c0_8 = arith.constant 0 : index
    %14 = vector.load %arg3[%c64, %c0_8] : memref<96x20xf32, #tpu.memory_space<vmem>>, vector<10x10xf32>
    %c80 = arith.constant 80 : index
    %c0_9 = arith.constant 0 : index
    %15 = vector.load %arg3[%c80, %c0_9] : memref<96x20xf32, #tpu.memory_space<vmem>>, vector<10x10xf32>
    %16 = tpu.concatenate %0, %1 in 1 : vector<32x10xf32>, vector<32x10xf32> -> vector<32x20xf32>
    %17 = vector.broadcast %3 : vector<1x20xf32> to vector<32x20xf32>
    %18 = arith.mulf %16, %17 : vector<32x20xf32>
    %19 = vector.broadcast %4 : vector<1x20xf32> to vector<32x20xf32>
    %20 = arith.addf %18, %19 : vector<32x20xf32>
    %cst = arith.constant 0.000000e+00 : f32
    %21 = vector.broadcast %cst : f32 to vector<32x20xf32>
    %22 = arith.maximumf %20, %21 : vector<32x20xf32>
    %cst_10 = arith.constant dense<0.000000e+00> : vector<32x20xf32>
    %23 = tpu.matmul %22, %12, %cst_10 {dimension_numbers = #tpu.dot_dimension_numbers<[1], [0], [0], [1], [0, 0, 1, 1], [], []>} : vector<32x20xf32>, vector<20x20xf32>, vector<32x20xf32> -> vector<32x20xf32>
    %24 = vector.broadcast %5 : vector<1x20xf32> to vector<32x20xf32>
    %25 = arith.mulf %23, %24 : vector<32x20xf32>
    %26 = vector.broadcast %6 : vector<1x20xf32> to vector<32x20xf32>
    %27 = arith.addf %25, %26 : vector<32x20xf32>
    %cst_11 = arith.constant 0.000000e+00 : f32
    %28 = vector.broadcast %cst_11 : f32 to vector<32x20xf32>
    %29 = arith.maximumf %27, %28 : vector<32x20xf32>
    %cst_12 = arith.constant dense<0.000000e+00> : vector<32x10xf32>
    %30 = tpu.matmul %29, %13, %cst_12 {dimension_numbers = #tpu.dot_dimension_numbers<[1], [0], [0], [1], [0, 0, 1, 1], [], []>} : vector<32x20xf32>, vector<20x10xf32>, vector<32x10xf32> -> vector<32x10xf32>
    %31 = vector.broadcast %7 : vector<1x10xf32> to vector<32x10xf32>
    %32 = arith.mulf %30, %31 : vector<32x10xf32>
    %33 = vector.broadcast %8 : vector<1x10xf32> to vector<32x10xf32>
    %34 = arith.addf %32, %33 : vector<32x10xf32>
    %cst_13 = arith.constant 0.000000e+00 : f32
    %35 = vector.broadcast %cst_13 : f32 to vector<32x10xf32>
    %36 = arith.maximumf %34, %35 : vector<32x10xf32>
    %cst_14 = arith.constant dense<0.000000e+00> : vector<32x10xf32>
    %37 = tpu.matmul %36, %14, %cst_14 {dimension_numbers = #tpu.dot_dimension_numbers<[1], [0], [0], [1], [0, 0, 1, 1], [], []>} : vector<32x10xf32>, vector<10x10xf32>, vector<32x10xf32> -> vector<32x10xf32>
    %38 = vector.broadcast %9 : vector<1x10xf32> to vector<32x10xf32>
    %39 = arith.mulf %37, %38 : vector<32x10xf32>
    %40 = vector.broadcast %10 : vector<1x10xf32> to vector<32x10xf32>
    %41 = arith.addf %39, %40 : vector<32x10xf32>
    %cst_15 = arith.constant 0.000000e+00 : f32
    %42 = vector.broadcast %cst_15 : f32 to vector<32x10xf32>
    %43 = arith.maximumf %41, %42 : vector<32x10xf32>
    %cst_16 = arith.constant dense<0.000000e+00> : vector<32x10xf32>
    %44 = tpu.matmul %43, %15, %cst_16 {dimension_numbers = #tpu.dot_dimension_numbers<[1], [0], [0], [1], [0, 0, 1, 1], [], []>} : vector<32x10xf32>, vector<10x10xf32>, vector<32x10xf32> -> vector<32x10xf32>
    %45 = vector.broadcast %11 : vector<1x10xf32> to vector<32x10xf32>
    %46 = arith.addf %44, %45 : vector<32x10xf32>
    %cst_17 = arith.constant dense<0xFF800000> : vector<32xf32>
    %47 = vector.multi_reduction <maximumf>, %46, %cst_17 [1] : vector<32x10xf32> to vector<32xf32>
    %48 = vector.shape_cast %47 : vector<32xf32> to vector<32x1xf32>
    %49 = vector.broadcast %48 : vector<32x1xf32> to vector<32x10xf32>
    %50 = arith.subf %46, %49 : vector<32x10xf32>
    %51 = math.exp %50 : vector<32x10xf32>
    %cst_18 = arith.constant dense<0.000000e+00> : vector<32xf32>
    %52 = vector.multi_reduction <add>, %51, %cst_18 [1] : vector<32x10xf32> to vector<32xf32>
    %53 = vector.shape_cast %52 : vector<32xf32> to vector<32x1xf32>
    %54 = math.log %53 : vector<32x1xf32>
    %55 = vector.broadcast %54 : vector<32x1xf32> to vector<32x10xf32>
    %56 = arith.subf %50, %55 : vector<32x10xf32>
    %c0_19 = arith.constant 0 : index
    %c0_20 = arith.constant 0 : index
    %57 = vector.load %arg5[%c0_19, %c0_20] : memref<32x10xf32, #tpu.memory_space<vmem>>, vector<32x10xf32>
    tpu.vector_store %arg5[%c0_19, %c0_20], %56 {strides = array<i32>} : memref<32x10xf32, #tpu.memory_space<vmem>>, vector<32x10xf32>,
    return
  }
  func.func @transform_0(%arg0: i32) -> (i32, i32) {
    %c0_i32 = arith.constant 0 : i32
    %c0_i32_0 = arith.constant 0 : i32
    return %arg0, %c0_i32 : i32, i32
  }
  func.func @transform_1(%arg0: i32) -> (i32, i32) {
    %c0_i32 = arith.constant 0 : i32
    %c0_i32_0 = arith.constant 0 : i32
    return %arg0, %c0_i32 : i32, i32
  }
  func.func @transform_2(%arg0: i32) -> (i32, i32) {
    %c0_i32 = arith.constant 0 : i32
    %c0_i32_0 = arith.constant 0 : i32
    %c0_i32_1 = arith.constant 0 : i32
    return %c0_i32, %c0_i32_0 : i32, i32
  }
  func.func @transform_3(%arg0: i32) -> (i32, i32) {
    %c0_i32 = arith.constant 0 : i32
    %c0_i32_0 = arith.constant 0 : i32
    %c0_i32_1 = arith.constant 0 : i32
    return %c0_i32, %c0_i32_0 : i32, i32
  }
  func.func @transform_4(%arg0: i32) -> (i32, i32) {
    %c0_i32 = arith.constant 0 : i32
    %c0_i32_0 = arith.constant 0 : i32
    return %arg0, %c0_i32 : i32, i32
  }
}

</mosaic_0001>

<bundles_post_ra>
// kernel: tpu_custom_call.1
= control target key start
LH: loop header
LB: loop body
LE: loop exit
PB: predicated region body
PF: predicated region fallthrough
CT: control target
= control target key end

     0   :  { %s387_s19 = smov 10   ;;  %vm85_vm0 = vcmask 1043456   ;;  %vm53_vm1 = vcmask 80896   ;;  %vm72_vm2 = vcmask 162816   ;;  %vm202_vm3 = vcmask 1041408   ;;  %s531_s1 = inlined_call_operand.vmem [shape: f32[32,10], index: 1, kind: input, shape index: {}]   ;;  %s532_s2 = inlined_call_operand.vmem [shape: f32[96,20], index: 2, kind: input, shape index: {}]   ;;  %s533_s3 = inlined_call_operand.vmem [shape: f32[16,20], index: 3, kind: input, shape index: {}]   ;;  %s534_s0 = inlined_call_operand.vmem [shape: f32[32,10], index: 0, kind: input, shape index: {}]   ;;  %s535_s4 = inlined_call_operand.vmem [shape: f32[32,10], index: 4, kind: output, shape index: {}]  }
   0x1   :  { %v21_v0 = vld [vmem:[%s531_s1] sm:$0xff]  ;;  %v23_v1 = vld [vmem:[%s531_s1 + $0x10] sm:$0xff]  ;;  %v22_v2 = vld [vmem:[%s531_s1 + $0x8] sm:$0xff] }
   0x2   :  { %41 = vrot.lane.b32.xlu0 %v21_v0, %s387_s19  ;;  %45 = vrot.lane.b32.xlu1 %v23_v1, %s387_s19  ;;  %v24_v3 = vld [vmem:[%s531_s1 + $0x18] sm:$0xff]  ;;  %v29_v4 = vld [vmem:[%s532_s2 + $0x10] sm:$0xf] }
   0x3   :  { %v28_v5 = vld [vmem:[%s532_s2 + $0x8] sm:$0xff]  ;;  %350 = vmatpush.msk.msra.mxu0 %vm85_vm0, %v29_v4  ;;  %v27_v6 = vld [vmem:[%s532_s2] sm:$0xff]  ;;  %v19_v18 = vld [vmem:[%s534_s0 + $0x10] sm:$0xff] }
   0x4   :  { %v438_v7 = vld [vmem:[%s533_s3] sm:$0xff]  ;;  %v18_v16 = vld [vmem:[%s534_s0 + $0x8] sm:$0xff]  ;;  %v20_v27 = vld [vmem:[%s534_s0 + $0x18] sm:$0xff] }
   0x5   :  { %103 = vmatpush.msra.mxu0 %v28_v5  ;;  %v58_v8 = vperm.slane %v438_v7, 0  ;;  %v17_v9 = vld [vmem:[%s534_s0] sm:$0xff]  ;;  %v63_v11 = vperm.slane %v438_v7, 1  ;;  %v32_v34 = vld [vmem:[%s532_s2 + $0x30] sm:$0xf]  ;;  %v31_v35 = vld [vmem:[%s532_s2 + $0x28] sm:$0xff] }
   0x6   :  { %355 = vmatpush.msk.msra.mxu1 %vm85_vm0, %v32_v34  ;;  %v30_v36 = vld [vmem:[%s532_s2 + $0x20] sm:$0xff]  ;;  %v118_v37 = vperm.slane %v438_v7, 2  ;;  %v123_v38 = vperm.slane %v438_v7, 3  ;;  %v34_v55 = vld [vmem:[%s532_s2 + $0x48] sm:$0x3]  ;;  %v176_v57 = vperm.slane %v438_v7, 4 }
   0x7   :  { %104 = vmatpush.msra.mxu0 %v27_v6  ;;  %360 = vmatpush.msk.msra.mxu2 %vm202_vm3, %v34_v55  ;;  %v33_v56 = vld [vmem:[%s532_s2 + $0x40] sm:$0xff]  ;;  %v181_v58 = vperm.slane %v438_v7, 5 }
   0x8   :  { %161 = vmatpush.msra.mxu1 %v31_v35 }
   0x9   :  { %221 = vmatpush.msra.mxu2 %v33_v56 }
   0xa   :  { %43 = vrot.lane.b32.xlu0 %v22_v2, %s387_s19  ;;  %47 = vrot.lane.b32.xlu1 %v24_v3, %s387_s19 }
   0xb   :  { %162 = vmatpush.msra.mxu1 %v30_v36 }
  0x74   :  { %v42_v10 = vpop.permute.xlu0 %41  ;;  %v46_v15 = vpop.permute.xlu1 %45 }
  0x75   :  { %v54_v12 = vsel %vm53_vm1, %v17_v9, %v42_v10  ;;  %v56_v21 = vsel %vm53_vm1, %v19_v18, %v46_v15  ;;  %v240_v15 = vperm.slane %v438_v7, 7 }
  0x76   :  { %v59_v13 = vmul.f32 %v58_v8, %v54_v12  ;;  %v61_v23 = vmul.f32 %v58_v8, %v56_v21  ;;  %v36_v12 = vld [vmem:[%s532_s2 + $0x58] sm:$0x3] }
  0x77   :  { %365 = vmatpush.msk.msra.mxu3 %vm202_vm3, %v36_v12 }
  0x78   :  { %v64_v14 = vadd.f32 %v63_v11, %v59_v13  ;;  %v66_v28 = vadd.f32 %v63_v11, %v61_v23  ;;  %v35_v13 = vld [vmem:[%s532_s2 + $0x50] sm:$0xff] }
  0x79   :  { %280 = vmatpush.msra.mxu3 %v35_v13 }
  0x7a   :  { %v68_v17 = vmax.f32 %v64_v14, 0.0  ;;  %v70_v31 = vmax.f32 %v66_v28, 0.0  ;;  %v235_v14 = vperm.slane %v438_v7, 6 }
  0x7c   :  { %v44_v19 = vpop.permute.xlu0 %43  ;;  %351 = vmatmul.msk.f32.vlgmr.msra.gmra.mxu0 %vm72_vm2, %v68_v17  ;;  %v48_v26 = vpop.permute.xlu1 %47 }
  0x7d   :  { %v55_v20 = vsel %vm53_vm1, %v18_v16, %v44_v19  ;;  %v57_v29 = vsel %vm53_vm1, %v20_v27, %v48_v26 }
  0x7e   :  { %v60_v22 = vmul.f32 %v58_v8, %v55_v20  ;;  %v62_v30 = vmul.f32 %v58_v8, %v57_v29 }
  0x80   :  { %v65_v24 = vadd.f32 %v63_v11, %v60_v22  ;;  %v67_v32 = vadd.f32 %v63_v11, %v62_v30 }
  0x82   :  { %v69_v25 = vmax.f32 %v65_v24, 0.0  ;;  %v71_v33 = vmax.f32 %v67_v32, 0.0 }
  0x84   :  { %352 = vmatmul.msk.f32.gmra.mxu0 %vm72_vm2, %v69_v25 }
  0x8c   :  { %353 = vmatmul.msk.f32.gmra.mxu0 %vm72_vm2, %v70_v31  ;;  %v26_v31 = vld [vmem:[%s533_s3 + $0x8] sm:$0xff] }
  0x8d   :  { %v249_v32 = vperm.slane %v26_v31, 0 }
  0x94   :  { %354 = vmatmul.msk.f32.gmra.mxu0 %vm72_vm2, %v71_v33 }
  0xf9   :  { %v106_v39 = vpop.f32.mrf.mxu0 }
  0xfa   :  { %v119_v40 = vmul.f32 %v118_v37, %v106_v39 }
  0xfc   :  { %v124_v41 = vadd.f32 %v123_v38, %v119_v40 }
  0xfe   :  { %v128_v42 = vmax.f32 %v124_v41, 0.0 }
 0x100   :  { %356 = vmatmul.msk.f32.vlgmr.msra.gmra.mxu1 %vm72_vm2, %v128_v42 }
 0x101   :  { %v109_v43 = vpop.f32.mrf.mxu0 }
 0x102   :  { %v120_v44 = vmul.f32 %v118_v37, %v109_v43 }
 0x104   :  { %v125_v45 = vadd.f32 %v123_v38, %v120_v44 }
 0x106   :  { %v129_v46 = vmax.f32 %v125_v45, 0.0 }
 0x108   :  { %357 = vmatmul.msk.f32.gmra.mxu1 %vm72_vm2, %v129_v46 }
 0x109   :  { %v112_v47 = vpop.f32.mrf.mxu0 }
 0x10a   :  { %v121_v48 = vmul.f32 %v118_v37, %v112_v47 }
 0x10c   :  { %v126_v49 = vadd.f32 %v123_v38, %v121_v48 }
 0x10e   :  { %v130_v50 = vmax.f32 %v126_v49, 0.0 }
 0x110   :  { %358 = vmatmul.msk.f32.gmra.mxu1 %vm72_vm2, %v130_v50 }
 0x111   :  { %v115_v51 = vpop.f32.mrf.mxu0 }
 0x112   :  { %v122_v52 = vmul.f32 %v118_v37, %v115_v51 }
 0x114   :  { %v127_v53 = vadd.f32 %v123_v38, %v122_v52 }
 0x116   :  { %v131_v54 = vmax.f32 %v127_v53, 0.0 }
 0x118   :  { %359 = vmatmul.msk.f32.gmra.mxu1 %vm72_vm2, %v131_v54 }
 0x17d   :  { %v164_v59 = vpop.f32.mrf.mxu1 }
 0x17e   :  { %v177_v60 = vmul.f32 %v176_v57, %v164_v59 }
 0x180   :  { %v182_v61 = vadd.f32 %v181_v58, %v177_v60 }
 0x182   :  { %v186_v62 = vmax.f32 %v182_v61, 0.0 }
 0x184   :  { %361 = vmatmul.msk.f32.vlgmr.msra.gmra.mxu2 %vm53_vm1, %v186_v62 }
 0x185   :  { %v167_v63 = vpop.f32.mrf.mxu1 }
 0x186   :  { %v178_v0 = vmul.f32 %v176_v57, %v167_v63 }
 0x188   :  { %v183_v1 = vadd.f32 %v181_v58, %v178_v0 }
 0x18a   :  { %v187_v2 = vmax.f32 %v183_v1, 0.0 }
 0x18c   :  { %362 = vmatmul.msk.f32.gmra.mxu2 %vm53_vm1, %v187_v2 }
 0x18d   :  { %v170_v3 = vpop.f32.mrf.mxu1 }
 0x18e   :  { %v179_v4 = vmul.f32 %v176_v57, %v170_v3 }
 0x190   :  { %v184_v5 = vadd.f32 %v181_v58, %v179_v4 }
 0x192   :  { %v188_v6 = vmax.f32 %v184_v5, 0.0 }
 0x194   :  { %363 = vmatmul.msk.f32.gmra.mxu2 %vm53_vm1, %v188_v6 }
 0x195   :  { %v173_v8 = vpop.f32.mrf.mxu1 }
 0x196   :  { %v180_v9 = vmul.f32 %v176_v57, %v173_v8 }
 0x198   :  { %v185_v10 = vadd.f32 %v181_v58, %v180_v9 }
 0x19a   :  { %v189_v11 = vmax.f32 %v185_v10, 0.0 }
 0x19c   :  { %364 = vmatmul.msk.f32.gmra.mxu2 %vm53_vm1, %v189_v11 }
 0x207   :  { %v223_v16 = vpop.f32.mrf.mxu2 }
 0x208   :  { %v236_v17 = vmul.f32 %v235_v14, %v223_v16 }
 0x20a   :  { %v241_v18 = vadd.f32 %v240_v15, %v236_v17 }
 0x20c   :  { %v245_v19 = vmax.f32 %v241_v18, 0.0 }
 0x20e   :  { %366 = vmatmul.msk.f32.vlgmr.msra.gmra.mxu3 %vm53_vm1, %v245_v19 }
 0x20f   :  { %v226_v20 = vpop.f32.mrf.mxu2 }
 0x210   :  { %v237_v21 = vmul.f32 %v235_v14, %v226_v20 }
 0x212   :  { %v242_v22 = vadd.f32 %v240_v15, %v237_v21 }
 0x214   :  { %v246_v23 = vmax.f32 %v242_v22, 0.0 }
 0x216   :  { %367 = vmatmul.msk.f32.gmra.mxu3 %vm53_vm1, %v246_v23 }
 0x217   :  { %v229_v24 = vpop.f32.mrf.mxu2 }
 0x218   :  { %v238_v25 = vmul.f32 %v235_v14, %v229_v24 }
 0x21a   :  { %v243_v26 = vadd.f32 %v240_v15, %v238_v25 }
 0x21c   :  { %v247_v27 = vmax.f32 %v243_v26, 0.0 }
 0x21e   :  { %368 = vmatmul.msk.f32.gmra.mxu3 %vm53_vm1, %v247_v27 }
 0x21f   :  { %v232_v28 = vpop.f32.mrf.mxu2 }
 0x220   :  { %v239_v7 = vmul.f32 %v235_v14, %v232_v28 }
 0x222   :  { %v244_v29 = vadd.f32 %v240_v15, %v239_v7 }
 0x224   :  { %v248_v30 = vmax.f32 %v244_v29, 0.0 }
 0x226   :  { %369 = vmatmul.msk.f32.gmra.mxu3 %vm53_vm1, %v248_v30 }
 0x291   :  { %v282_v33 = vpop.f32.mrf.mxu3 }
 0x292   :  { %v283_v34 = vadd.f32 %v282_v33, %v249_v32 }
 0x294   :  { %v294_v35 = vsel %vm53_vm1, %v283_v34, -inf }
 0x295   :  { %295 = vmax.xlane.f32.xlu2 %v294_v35 }
 0x299   :  { %v285_v36 = vpop.f32.mrf.mxu3 }
 0x29a   :  { %v286_v37 = vadd.f32 %v285_v36, %v249_v32 }
 0x29c   :  { %v297_v38 = vsel %vm53_vm1, %v286_v37, -inf }
 0x29d   :  { %298 = vmax.xlane.f32.xlu2 %v297_v38 }
 0x2a1   :  { %v288_v39 = vpop.f32.mrf.mxu3 }
 0x2a2   :  { %v289_v40 = vadd.f32 %v288_v39, %v249_v32 }
 0x2a4   :  { %v300_v41 = vsel %vm53_vm1, %v289_v40, -inf }
 0x2a5   :  { %301 = vmax.xlane.f32.xlu0 %v300_v41 }
 0x2a9   :  { %v291_v42 = vpop.f32.mrf.mxu3 }
 0x2aa   :  { %v292_v43 = vadd.f32 %v291_v42, %v249_v32 }
 0x2ac   :  { %v303_v44 = vsel %vm53_vm1, %v292_v43, -inf }
 0x2ad   :  { %304 = vmax.xlane.f32.xlu1 %v303_v44 }
 0x308   :  { %v296_v45 = vpop.xlane.xlu2 %295 }
 0x309   :  { %v306_v46 = vsub.f32 %v283_v34, %v296_v45 }
 0x30b   :  { %v310_v47 = vmul.f32 1.442695, %v306_v46 }
 0x30d   :  { %371 = vpow2.f32 %v310_v47 }
 0x310   :  { %v299_v48 = vpop.xlane.xlu2 %298 }
 0x311   :  { %v307_v49 = vsub.f32 %v286_v37, %v299_v48 }
 0x313   :  { %v372_v50 = vpop.eup %371  ;;  %v312_v51 = vmul.f32 1.442695, %v307_v49 }
 0x314   :  { %v318_v52 = vsel %vm53_vm1, %v372_v50, 0.0 }
 0x315   :  { %373 = vpow2.f32 %v312_v51  ;;  %319 = vadd.xlane.f32.xlu2 %v318_v52 }
 0x318   :  { %v302_v53 = vpop.xlane.xlu0 %301 }
 0x319   :  { %v308_v54 = vsub.f32 %v289_v40, %v302_v53 }
 0x31b   :  { %v374_v55 = vpop.eup %373  ;;  %v314_v56 = vmul.f32 1.442695, %v308_v54 }
 0x31c   :  { %v321_v57 = vsel %vm53_vm1, %v374_v55, 0.0 }
 0x31d   :  { %375 = vpow2.f32 %v314_v56  ;;  %322 = vadd.xlane.f32.xlu2 %v321_v57 }
 0x320   :  { %v305_v58 = vpop.xlane.xlu1 %304 }
 0x321   :  { %v309_v59 = vsub.f32 %v292_v43, %v305_v58 }
 0x323   :  { %v376_v60 = vpop.eup %375  ;;  %v316_v61 = vmul.f32 1.442695, %v309_v59 }
 0x324   :  { %v324_v62 = vsel %vm53_vm1, %v376_v60, 0.0 }
 0x325   :  { %377 = vpow2.f32 %v316_v61  ;;  %325 = vadd.xlane.f32.xlu2 %v324_v62 }
 0x32b   :  { %v378_v63 = vpop.eup %377 }
 0x32c   :  { %v327_v0 = vsel %vm53_vm1, %v378_v63, 0.0 }
 0x32d   :  { %328 = vadd.xlane.f32.xlu2 %v327_v0 }
 0x388   :  { %v320_v1 = vpop.xlane.xlu2 %319 }
 0x389   :  { %379 = vlog2.f32 %v320_v1 }
 0x38f   :  { %v380_v2 = vpop.eup %379 }
 0x390   :  { %v331_v3 = vmul.f32 0.6931472, %v380_v2  ;;  %v323_v4 = vpop.xlane.xlu2 %322 }
 0x391   :  { %381 = vlog2.f32 %v323_v4 }
 0x392   :  { %v338_v5 = vsub.f32 %v306_v46, %v331_v3 }
 0x394   :  { %342 = vst.msk [vmem:[%s535_s4] sm:$0xff] %vm53_vm1, %v338_v5 }
 0x397   :  { %v382_v6 = vpop.eup %381 }
 0x398   :  { %v333_v8 = vmul.f32 0.6931472, %v382_v6  ;;  %v326_v9 = vpop.xlane.xlu2 %325 }
 0x399   :  { %383 = vlog2.f32 %v326_v9 }
 0x39a   :  { %v339_v10 = vsub.f32 %v307_v49, %v333_v8 }
 0x39c   :  { %343 = vst.msk [vmem:[%s535_s4 + $0x8] sm:$0xff] %vm53_vm1, %v339_v10 }
 0x39f   :  { %v384_v11 = vpop.eup %383 }
 0x3a0   :  { %v335_v12 = vmul.f32 0.6931472, %v384_v11  ;;  %v329_v13 = vpop.xlane.xlu2 %328 }
 0x3a1   :  { %385 = vlog2.f32 %v329_v13 }
 0x3a2   :  { %v340_v14 = vsub.f32 %v308_v54, %v335_v12 }
 0x3a4   :  { %344 = vst.msk [vmem:[%s535_s4 + $0x10] sm:$0xff] %vm53_vm1, %v340_v14 }
 0x3a7   :  { %v386_v15 = vpop.eup %385 }
 0x3a8   :  { %v337_v16 = vmul.f32 0.6931472, %v386_v15 }
 0x3aa   :  { %v341_v17 = vsub.f32 %v309_v59, %v337_v16 }
 0x3ac   :  { %345 = vst.msk [vmem:[%s535_s4 + $0x18] sm:$0xff] %vm53_vm1, %v341_v17 }

</bundles_post_ra>
